<compile_context>
chip_gen: v7x
topology: tpu7x:2x2x1
jax: 0.10.0
libtpu: 0.0.40
codegen_flags: <defaults>
</compile_context>

<pallas_src>
import math
from functools import partial

import numpy as np
import jax
import jax.numpy as jnp
from jax.experimental import pallas as pl
from jax.experimental.pallas import tpu as pltpu


def _gqa_flash_kernel(q_ref, k_ref, v_ref,
                      wq_ref, bq_ref, wk_ref, bk_ref, wv_ref, bv_ref,
                      wo_ref, bo_ref,
                      out_ref,
                      q_s, m_s, l_s, acc_s,
                      *, num_heads, num_groups, head_dim):
    f32 = jnp.float32
    ki = pl.program_id(2)
    heads_per_group = num_heads // num_groups
    scale = 1.0 / math.sqrt(head_dim)

    # --- once per (batch, q-tile): head-batched Q projection + reset softmax state
    @pl.when(ki == 0)
    def _init():
        x = q_ref[0]                                              # (bq, E)
        bq_len, e = x.shape
        xb = jnp.broadcast_to(x[None, :, :], (num_heads, bq_len, e))
        q = jax.lax.dot_general(
            xb, wq_ref[...],
            dimension_numbers=(((2,), (1,)), ((0,), (0,))),
            preferred_element_type=f32)                            # (H, bq, D)
        q_s[...] = (q + bq_ref[...]) * scale                       # scale folded into q
        m_s[...] = jnp.full_like(m_s, -jnp.inf)
        l_s[...] = jnp.zeros_like(l_s)
        acc_s[...] = jnp.zeros_like(acc_s)

    # --- project this KV tile once per group, then share across the group's heads
    xk = k_ref[0]                                                  # (bkv, E)
    xv = v_ref[0]
    bkv_len, e = xk.shape
    xkb = jnp.broadcast_to(xk[None, :, :], (num_groups, bkv_len, e))
    xvb = jnp.broadcast_to(xv[None, :, :], (num_groups, bkv_len, e))
    k = jax.lax.dot_general(xkb, wk_ref[...],
                            dimension_numbers=(((2,), (1,)), ((0,), (0,))),
                            preferred_element_type=f32) + bk_ref[...]   # (G, bkv, D)
    v = jax.lax.dot_general(xvb, wv_ref[...],
                            dimension_numbers=(((2,), (1,)), ((0,), (0,))),
                            preferred_element_type=f32) + bv_ref[...]   # (G, bkv, D)

    # repeat_interleave on the leading head axis == torch enable_gqa head->group map
    k = jnp.broadcast_to(
        k[:, None], (num_groups, heads_per_group, bkv_len, head_dim)
    ).reshape(num_heads, bkv_len, head_dim)                        # (H, bkv, D)
    v = jnp.broadcast_to(
        v[:, None], (num_groups, heads_per_group, bkv_len, head_dim)
    ).reshape(num_heads, bkv_len, head_dim)                        # (H, bkv, D)

    # --- one batched QK^T over all heads
    q = q_s[...]                                                   # (H, bq, D), pre-scaled
    s = jax.lax.dot_general(q, k,
                            dimension_numbers=(((2,), (2,)), ((0,), (0,))),
                            preferred_element_type=f32)            # (H, bq, bkv)

    # --- online (flash) softmax update
    m_prev = m_s[...]
    m_new = jnp.maximum(m_prev, jnp.max(s, axis=-1, keepdims=True))
    alpha = jnp.exp(m_prev - m_new)
    p = jnp.exp(s - m_new)
    l_s[...] = alpha * l_s[...] + jnp.sum(p, axis=-1, keepdims=True)
    pv = jax.lax.dot_general(p, v,
                             dimension_numbers=(((2,), (1,)), ((0,), (0,))),
                             preferred_element_type=f32)           # (H, bq, D)
    acc_s[...] = alpha * acc_s[...] + pv
    m_s[...] = m_new

    # --- last KV tile: normalize, apply output projection, write the output block
    @pl.when(ki == pl.num_programs(2) - 1)
    def _finalize():
        o = acc_s[...] / l_s[...]                                  # (H, bq, D)
        oh = jax.lax.dot_general(o, wo_ref[...],
                                 dimension_numbers=(((2,), (1,)), ((0,), (0,))),
                                 preferred_element_type=f32)       # (H, bq, E)
        out = jnp.sum(oh, axis=0) + bo_ref[...]                    # (bq, E)
        out_ref[0] = out.astype(out_ref.dtype)


def simple_gqa_forward(query, key, value, params, *, num_heads, num_groups, head_dim,
                       block_q=None, block_kv=None):
    """Fused GQA forward. Returns (output, None) to mirror the PyTorch module."""
    B, S, E = query.shape
    assert num_heads % num_groups == 0
    assert E == num_heads * head_dim

    if block_q is None:
        block_q = min(S, 128)
    if block_kv is None:
        block_kv = min(S, 128)
    assert S % block_q == 0 and S % block_kv == 0

    H, G, D = num_heads, num_groups, head_dim

    # Host-side weight re-arrangement (free relative to the kernel):
    # per-head / per-group leading axes so the kernel only does batched dot_generals.
    wq_h = params["wq"].reshape(E, H, D).transpose(1, 0, 2)     # (H, E, D)
    bq_h = params["bq"].reshape(H, 1, D)                        # (H, 1, D)
    wk_g = params["wk"].reshape(E, G, D).transpose(1, 0, 2)     # (G, E, D)
    bk_g = params["bk"].reshape(G, 1, D)                        # (G, 1, D)
    wv_g = params["wv"].reshape(E, G, D).transpose(1, 0, 2)     # (G, E, D)
    bv_g = params["bv"].reshape(G, 1, D)                        # (G, 1, D)
    wo_h = params["wo"].reshape(H, D, E)                        # (H, D, E)
    bo = params["bo"]                                           # (1, E)

    grid = (B, S // block_q, S // block_kv)

    def const3(shape):
        return pl.BlockSpec(shape, lambda b, qi, ki: (0, 0, 0))

    def const2(shape):
        return pl.BlockSpec(shape, lambda b, qi, ki: (0, 0))

    in_specs = [
        pl.BlockSpec((1, block_q, E), lambda b, qi, ki: (b, qi, 0)),   # query tile
        pl.BlockSpec((1, block_kv, E), lambda b, qi, ki: (b, ki, 0)),  # key tile
        pl.BlockSpec((1, block_kv, E), lambda b, qi, ki: (b, ki, 0)),  # value tile
        const3((H, E, D)), const3((H, 1, D)),                          # q_proj
        const3((G, E, D)), const3((G, 1, D)),                          # k_proj
        const3((G, E, D)), const3((G, 1, D)),                          # v_proj
        const3((H, D, E)), const2((1, E)),                             # out_proj
    ]
    out_specs = pl.BlockSpec((1, block_q, E), lambda b, qi, ki: (b, qi, 0))

    kernel = partial(_gqa_flash_kernel, num_heads=H, num_groups=G, head_dim=D)

    out = pl.pallas_call(
        kernel,
        out_shape=jax.ShapeDtypeStruct((B, S, E), query.dtype),
        grid_spec=pltpu.PrefetchScalarGridSpec(
            num_scalar_prefetch=0,
            grid=grid,
            in_specs=in_specs,
            out_specs=out_specs,
            scratch_shapes=[
                pltpu.VMEM((H, block_q, D), jnp.float32),   # q (scaled, per head)
                pltpu.VMEM((H, block_q, 1), jnp.float32),   # running max
                pltpu.VMEM((H, block_q, 1), jnp.float32),   # running denom
                pltpu.VMEM((H, block_q, D), jnp.float32),   # output accumulator
            ]),
        compiler_params=pltpu.CompilerParams(
            dimension_semantics=("parallel", "parallel", "arbitrary"),
            vmem_limit_bytes=32 * 1024 * 1024),
    )(query, key, value, wq_h, bq_h, wk_g, bk_g, wv_g, bv_g, wo_h, bo)
    return out, None


def simple_gqa_reference(query, key, value, params, *, num_heads, num_groups, head_dim):
    """Pure-JAX reference mirroring the PyTorch SimpleGQA.forward."""
    B, S, E = query.shape
    q = (query @ params["wq"] + params["bq"]).reshape(B, S, num_heads, head_dim)
    k = (key @ params["wk"] + params["bk"]).reshape(B, S, num_groups, head_dim)
    v = (value @ params["wv"] + params["bv"]).reshape(B, S, num_groups, head_dim)
    q = q.transpose(0, 2, 1, 3)
    k = k.transpose(0, 2, 1, 3)
    v = v.transpose(0, 2, 1, 3)
    rep = num_heads // num_groups
    k = jnp.repeat(k, rep, axis=1)   # repeat_interleave == torch enable_gqa
    v = jnp.repeat(v, rep, axis=1)
    scores = jnp.einsum("bhsd,bhtd->bhst", q, k) / math.sqrt(head_dim)
    p = jax.nn.softmax(scores, axis=-1)
    out = jnp.einsum("bhst,bhtd->bhsd", p, v)
    out = out.transpose(0, 2, 1, 3).reshape(B, S, E)
    return out @ params["wo"] + params["bo"]


def init_params(key, embed_dim, num_heads, num_groups, head_dim):
    """Deterministic synthetic init. Weights stored as (in, out); bias as (1, out)."""
    GD = num_groups * head_dim

    def linear(k, fan_in, fan_out):
        kw, kb = jax.random.split(k)
        bound = 1.0 / math.sqrt(fan_in)
        w = jax.random.uniform(kw, (fan_in, fan_out), jnp.float32, -bound, bound)
        b = jax.random.uniform(kb, (1, fan_out), jnp.float32, -bound, bound)
        return w, b

    ks = jax.random.split(key, 4)
    wq, bq = linear(ks[0], embed_dim, embed_dim)
    wk, bk = linear(ks[1], embed_dim, GD)
    wv, bv = linear(ks[2], embed_dim, GD)
    wo, bo = linear(ks[3], embed_dim, embed_dim)
    return dict(wq=wq, bq=bq, wk=wk, bk=bk, wv=wv, bv=bv, wo=wo, bo=bo)


if __name__ == "__main__":
    # Small shapes consistent with the module's forward.
    embed_dim = 32
    num_query_heads = 4
    num_groups = 2                      # GQA (enable_gqa=True path)
    head_dim = embed_dim // num_query_heads
    B, S = 2, 8

    root = jax.random.PRNGKey(0)
    k_in, k_par = jax.random.split(root)
    kq, kk, kv = jax.random.split(k_in, 3)
    query = jax.random.normal(kq, (B, S, embed_dim), jnp.float32)
    key_in = jax.random.normal(kk, (B, S, embed_dim), jnp.float32)
    value = jax.random.normal(kv, (B, S, embed_dim), jnp.float32)

    params = init_params(k_par, embed_dim, num_query_heads, num_groups, head_dim)

    out, _ = simple_gqa_forward(query, key_in, value, params,
                                num_heads=num_query_heads,
                                num_groups=num_groups,
                                head_dim=head_dim)
    out = jax.block_until_ready(out)

    ref = simple_gqa_reference(query, key_in, value, params,
                               num_heads=num_query_heads,
                               num_groups=num_groups,
                               head_dim=head_dim)
    np.testing.assert_allclose(np.asarray(out), np.asarray(ref),
                               rtol=1e-4, atol=2e-5)
    print("KERNEL_OK")
</pallas_src>

<mosaic_0001>
module attributes {stable_mosaic.version = 11 : i64} {
  func.func @_gqa_flash_kernel(%arg0: i32, %arg1: i32, %arg2: i32, %arg3: memref<1x8x32xf32, #tpu.memory_space<vmem>>, %arg4: memref<1x8x32xf32, #tpu.memory_space<vmem>>, %arg5: memref<1x8x32xf32, #tpu.memory_space<vmem>>, %arg6: memref<4x32x8xf32, #tpu.memory_space<vmem>>, %arg7: memref<4x1x8xf32, #tpu.memory_space<vmem>>, %arg8: memref<2x32x8xf32, #tpu.memory_space<vmem>>, %arg9: memref<2x1x8xf32, #tpu.memory_space<vmem>>, %arg10: memref<2x32x8xf32, #tpu.memory_space<vmem>>, %arg11: memref<2x1x8xf32, #tpu.memory_space<vmem>>, %arg12: memref<4x8x32xf32, #tpu.memory_space<vmem>>, %arg13: memref<1x32xf32, #tpu.memory_space<vmem>>, %arg14: memref<1x8x32xf32, #tpu.memory_space<vmem>>, %arg15: memref<4x8x8xf32, #tpu.memory_space<vmem>>, %arg16: memref<4x8x1xf32, #tpu.memory_space<vmem>>, %arg17: memref<4x8x1xf32, #tpu.memory_space<vmem>>, %arg18: memref<4x8x8xf32, #tpu.memory_space<vmem>>) attributes {dimension_semantics = [#tpu.dimension_semantics<parallel>, #tpu.dimension_semantics<parallel>, #tpu.dimension_semantics<arbitrary>], iteration_bounds = array<i64: 2, 1, 1>, scalar_prefetch = 0 : i64, scratch_operands = 4 : i64, tpu.core_type = #tpu.core_type<tc>, window_params = [{transform_indices = @transform_0, window_bounds = array<i64: 1, 8, 32>}, {transform_indices = @transform_1, window_bounds = array<i64: 1, 8, 32>}, {transform_indices = @transform_2, window_bounds = array<i64: 1, 8, 32>}, {pipeline_mode = #tpu.pipeline_mode<synchronous>, transform_indices = @transform_3, window_bounds = array<i64: 4, 32, 8>}, {pipeline_mode = #tpu.pipeline_mode<synchronous>, transform_indices = @transform_4, window_bounds = array<i64: 4, 1, 8>}, {pipeline_mode = #tpu.pipeline_mode<synchronous>, transform_indices = @transform_5, window_bounds = array<i64: 2, 32, 8>}, {pipeline_mode = #tpu.pipeline_mode<synchronous>, transform_indices = @transform_6, window_bounds = array<i64: 2, 1, 8>}, {pipeline_mode = #tpu.pipeline_mode<synchronous>, transform_indices = @transform_7, window_bounds = array<i64: 2, 32, 8>}, {pipeline_mode = #tpu.pipeline_mode<synchronous>, transform_indices = @transform_8, window_bounds = array<i64: 2, 1, 8>}, {pipeline_mode = #tpu.pipeline_mode<synchronous>, transform_indices = @transform_9, window_bounds = array<i64: 4, 8, 32>}, {pipeline_mode = #tpu.pipeline_mode<synchronous>, transform_indices = @transform_10, window_bounds = array<i64: 1, 32>}, {transform_indices = @transform_11, window_bounds = array<i64: 1, 8, 32>}]} {
    %c0_i32 = arith.constant 0 : i32
    %0 = arith.cmpi eq, %arg2, %c0_i32 : i32
    %1 = arith.extui %0 : i1 to i32
    %c0_i32_0 = arith.constant 0 : i32
    %2 = arith.cmpi ne, %1, %c0_i32_0 : i32
    scf.if %2 {
      %c0_46 = arith.constant 0 : index
      %c0_47 = arith.constant 0 : index
      %c0_48 = arith.constant 0 : index
      %58 = vector.load %arg3[%c0_46, %c0_47, %c0_48] : memref<1x8x32xf32, #tpu.memory_space<vmem>>, vector<1x8x32xf32>
      %59 = vector.shape_cast %58 : vector<1x8x32xf32> to vector<8x32xf32>
      %60 = vector.shape_cast %59 : vector<8x32xf32> to vector<1x8x32xf32>
      %61 = vector.shape_cast %60 : vector<1x8x32xf32> to vector<1x8x32xf32>
      %62 = vector.broadcast %61 : vector<1x8x32xf32> to vector<4x8x32xf32>
      %c0_49 = arith.constant 0 : index
      %c0_50 = arith.constant 0 : index
      %c0_51 = arith.constant 0 : index
      %63 = vector.load %arg6[%c0_49, %c0_50, %c0_51] : memref<4x32x8xf32, #tpu.memory_space<vmem>>, vector<4x32x8xf32>
      %cst_52 = arith.constant dense<0.000000e+00> : vector<4x8x8xf32>
      %64 = tpu.matmul %62, %63, %cst_52 {dimension_numbers = #tpu.dot_dimension_numbers<[2], [1], [1], [2], [0, 0, 0, 1, 1, 2], [0], [0]>} : vector<4x8x32xf32>, vector<4x32x8xf32>, vector<4x8x8xf32> -> vector<4x8x8xf32>
      %c0_53 = arith.constant 0 : index
      %c0_54 = arith.constant 0 : index
      %c0_55 = arith.constant 0 : index
      %65 = vector.load %arg7[%c0_53, %c0_54, %c0_55] : memref<4x1x8xf32, #tpu.memory_space<vmem>>, vector<4x1x8xf32>
      %66 = vector.broadcast %65 : vector<4x1x8xf32> to vector<4x8x8xf32>
      %67 = arith.addf %64, %66 : vector<4x8x8xf32>
      %cst_56 = arith.constant 0.353553385 : f32
      %68 = vector.broadcast %cst_56 : f32 to vector<4x8x8xf32>
      %69 = arith.mulf %67, %68 : vector<4x8x8xf32>
      %c0_57 = arith.constant 0 : index
      %c0_58 = arith.constant 0 : index
      %c0_59 = arith.constant 0 : index
      %70 = vector.load %arg15[%c0_57, %c0_58, %c0_59] : memref<4x8x8xf32, #tpu.memory_space<vmem>>, vector<4x8x8xf32>
      tpu.vector_store %arg15[%c0_57, %c0_58, %c0_59], %69 {strides = array<i32>} : memref<4x8x8xf32, #tpu.memory_space<vmem>>, vector<4x8x8xf32>,
      %cst_60 = arith.constant 0xFF800000 : f32
      %71 = vector.broadcast %cst_60 : f32 to vector<4x8x1xf32>
      %c0_61 = arith.constant 0 : index
      %c0_62 = arith.constant 0 : index
      %c0_63 = arith.constant 0 : index
      %72 = vector.load %arg16[%c0_61, %c0_62, %c0_63] : memref<4x8x1xf32, #tpu.memory_space<vmem>>, vector<4x8x1xf32>
      tpu.vector_store %arg16[%c0_61, %c0_62, %c0_63], %71 {strides = array<i32>} : memref<4x8x1xf32, #tpu.memory_space<vmem>>, vector<4x8x1xf32>,
      %cst_64 = arith.constant 0.000000e+00 : f32
      %73 = vector.broadcast %cst_64 : f32 to vector<4x8x1xf32>
      %c0_65 = arith.constant 0 : index
      %c0_66 = arith.constant 0 : index
      %c0_67 = arith.constant 0 : index
      %74 = vector.load %arg17[%c0_65, %c0_66, %c0_67] : memref<4x8x1xf32, #tpu.memory_space<vmem>>, vector<4x8x1xf32>
      tpu.vector_store %arg17[%c0_65, %c0_66, %c0_67], %73 {strides = array<i32>} : memref<4x8x1xf32, #tpu.memory_space<vmem>>, vector<4x8x1xf32>,
      %cst_68 = arith.constant 0.000000e+00 : f32
      %75 = vector.broadcast %cst_68 : f32 to vector<4x8x8xf32>
      %c0_69 = arith.constant 0 : index
      %c0_70 = arith.constant 0 : index
      %c0_71 = arith.constant 0 : index
      %76 = vector.load %arg18[%c0_69, %c0_70, %c0_71] : memref<4x8x8xf32, #tpu.memory_space<vmem>>, vector<4x8x8xf32>
      tpu.vector_store %arg18[%c0_69, %c0_70, %c0_71], %75 {strides = array<i32>} : memref<4x8x8xf32, #tpu.memory_space<vmem>>, vector<4x8x8xf32>,
    } else {
    }
    %c0 = arith.constant 0 : index
    %c0_1 = arith.constant 0 : index
    %c0_2 = arith.constant 0 : index
    %3 = vector.load %arg4[%c0, %c0_1, %c0_2] : memref<1x8x32xf32, #tpu.memory_space<vmem>>, vector<1x8x32xf32>
    %4 = vector.shape_cast %3 : vector<1x8x32xf32> to vector<8x32xf32>
    %c0_3 = arith.constant 0 : index
    %c0_4 = arith.constant 0 : index
    %c0_5 = arith.constant 0 : index
    %5 = vector.load %arg5[%c0_3, %c0_4, %c0_5] : memref<1x8x32xf32, #tpu.memory_space<vmem>>, vector<1x8x32xf32>
    %6 = vector.shape_cast %5 : vector<1x8x32xf32> to vector<8x32xf32>
    %7 = vector.shape_cast %4 : vector<8x32xf32> to vector<1x8x32xf32>
    %8 = vector.shape_cast %7 : vector<1x8x32xf32> to vector<1x8x32xf32>
    %9 = vector.broadcast %8 : vector<1x8x32xf32> to vector<2x8x32xf32>
    %10 = vector.shape_cast %6 : vector<8x32xf32> to vector<1x8x32xf32>
    %11 = vector.shape_cast %10 : vector<1x8x32xf32> to vector<1x8x32xf32>
    %12 = vector.broadcast %11 : vector<1x8x32xf32> to vector<2x8x32xf32>
    %c0_6 = arith.constant 0 : index
    %c0_7 = arith.constant 0 : index
    %c0_8 = arith.constant 0 : index
    %13 = vector.load %arg8[%c0_6, %c0_7, %c0_8] : memref<2x32x8xf32, #tpu.memory_space<vmem>>, vector<2x32x8xf32>
    %cst = arith.constant dense<0.000000e+00> : vector<2x8x8xf32>
    %14 = tpu.matmul %9, %13, %cst {dimension_numbers = #tpu.dot_dimension_numbers<[2], [1], [1], [2], [0, 0, 0, 1, 1, 2], [0], [0]>} : vector<2x8x32xf32>, vector<2x32x8xf32>, vector<2x8x8xf32> -> vector<2x8x8xf32>
    %c0_9 = arith.constant 0 : index
    %c0_10 = arith.constant 0 : index
    %c0_11 = arith.constant 0 : index
    %15 = vector.load %arg9[%c0_9, %c0_10, %c0_11] : memref<2x1x8xf32, #tpu.memory_space<vmem>>, vector<2x1x8xf32>
    %16 = vector.broadcast %15 : vector<2x1x8xf32> to vector<2x8x8xf32>
    %17 = arith.addf %14, %16 : vector<2x8x8xf32>
    %c0_12 = arith.constant 0 : index
    %c0_13 = arith.constant 0 : index
    %c0_14 = arith.constant 0 : index
    %18 = vector.load %arg10[%c0_12, %c0_13, %c0_14] : memref<2x32x8xf32, #tpu.memory_space<vmem>>, vector<2x32x8xf32>
    %cst_15 = arith.constant dense<0.000000e+00> : vector<2x8x8xf32>
    %19 = tpu.matmul %12, %18, %cst_15 {dimension_numbers = #tpu.dot_dimension_numbers<[2], [1], [1], [2], [0, 0, 0, 1, 1, 2], [0], [0]>} : vector<2x8x32xf32>, vector<2x32x8xf32>, vector<2x8x8xf32> -> vector<2x8x8xf32>
    %c0_16 = arith.constant 0 : index
    %c0_17 = arith.constant 0 : index
    %c0_18 = arith.constant 0 : index
    %20 = vector.load %arg11[%c0_16, %c0_17, %c0_18] : memref<2x1x8xf32, #tpu.memory_space<vmem>>, vector<2x1x8xf32>
    %21 = vector.broadcast %20 : vector<2x1x8xf32> to vector<2x8x8xf32>
    %22 = arith.addf %19, %21 : vector<2x8x8xf32>
    %23 = vector.shape_cast %17 : vector<2x8x8xf32> to vector<2x1x8x8xf32>
    %24 = vector.shape_cast %23 : vector<2x1x8x8xf32> to vector<2x1x8x8xf32>
    %25 = vector.broadcast %24 : vector<2x1x8x8xf32> to vector<2x2x8x8xf32>
    %26 = vector.shape_cast %25 : vector<2x2x8x8xf32> to vector<4x8x8xf32>
    %27 = vector.shape_cast %22 : vector<2x8x8xf32> to vector<2x1x8x8xf32>
    %28 = vector.shape_cast %27 : vector<2x1x8x8xf32> to vector<2x1x8x8xf32>
    %29 = vector.broadcast %28 : vector<2x1x8x8xf32> to vector<2x2x8x8xf32>
    %30 = vector.shape_cast %29 : vector<2x2x8x8xf32> to vector<4x8x8xf32>
    %c0_19 = arith.constant 0 : index
    %c0_20 = arith.constant 0 : index
    %c0_21 = arith.constant 0 : index
    %31 = vector.load %arg15[%c0_19, %c0_20, %c0_21] : memref<4x8x8xf32, #tpu.memory_space<vmem>>, vector<4x8x8xf32>
    %cst_22 = arith.constant dense<0.000000e+00> : vector<4x8x8xf32>
    %32 = tpu.matmul %31, %26, %cst_22 {dimension_numbers = #tpu.dot_dimension_numbers<[2], [2], [1], [1], [0, 0, 0, 1, 1, 1], [0], [0]>} : vector<4x8x8xf32>, vector<4x8x8xf32>, vector<4x8x8xf32> -> vector<4x8x8xf32>
    %c0_23 = arith.constant 0 : index
    %c0_24 = arith.constant 0 : index
    %c0_25 = arith.constant 0 : index
    %33 = vector.load %arg16[%c0_23, %c0_24, %c0_25] : memref<4x8x1xf32, #tpu.memory_space<vmem>>, vector<4x8x1xf32>
    %cst_26 = arith.constant dense<0xFF800000> : vector<4x8xf32>
    %34 = vector.multi_reduction <maximumf>, %32, %cst_26 [2] : vector<4x8x8xf32> to vector<4x8xf32>
    %35 = vector.shape_cast %34 : vector<4x8xf32> to vector<4x8x1xf32>
    %36 = arith.maximumf %33, %35 : vector<4x8x1xf32>
    %37 = arith.subf %33, %36 : vector<4x8x1xf32>
    %38 = math.exp %37 : vector<4x8x1xf32>
    %39 = vector.broadcast %36 : vector<4x8x1xf32> to vector<4x8x8xf32>
    %40 = arith.subf %32, %39 : vector<4x8x8xf32>
    %41 = math.exp %40 : vector<4x8x8xf32>
    %c0_27 = arith.constant 0 : index
    %c0_28 = arith.constant 0 : index
    %c0_29 = arith.constant 0 : index
    %42 = vector.load %arg17[%c0_27, %c0_28, %c0_29] : memref<4x8x1xf32, #tpu.memory_space<vmem>>, vector<4x8x1xf32>
    %43 = arith.mulf %38, %42 : vector<4x8x1xf32>
    %cst_30 = arith.constant dense<0.000000e+00> : vector<4x8xf32>
    %44 = vector.multi_reduction <add>, %41, %cst_30 [2] : vector<4x8x8xf32> to vector<4x8xf32>
    %45 = vector.shape_cast %44 : vector<4x8xf32> to vector<4x8x1xf32>
    %46 = arith.addf %43, %45 : vector<4x8x1xf32>
    %c0_31 = arith.constant 0 : index
    %c0_32 = arith.constant 0 : index
    %c0_33 = arith.constant 0 : index
    %47 = vector.load %arg17[%c0_31, %c0_32, %c0_33] : memref<4x8x1xf32, #tpu.memory_space<vmem>>, vector<4x8x1xf32>
    tpu.vector_store %arg17[%c0_31, %c0_32, %c0_33], %46 {strides = array<i32>} : memref<4x8x1xf32, #tpu.memory_space<vmem>>, vector<4x8x1xf32>,
    %cst_34 = arith.constant dense<0.000000e+00> : vector<4x8x8xf32>
    %48 = tpu.matmul %41, %30, %cst_34 {dimension_numbers = #tpu.dot_dimension_numbers<[2], [1], [1], [2], [0, 0, 0, 1, 1, 2], [0], [0]>} : vector<4x8x8xf32>, vector<4x8x8xf32>, vector<4x8x8xf32> -> vector<4x8x8xf32>
    %c0_35 = arith.constant 0 : index
    %c0_36 = arith.constant 0 : index
    %c0_37 = arith.constant 0 : index
    %49 = vector.load %arg18[%c0_35, %c0_36, %c0_37] : memref<4x8x8xf32, #tpu.memory_space<vmem>>, vector<4x8x8xf32>
    %50 = vector.broadcast %38 : vector<4x8x1xf32> to vector<4x8x8xf32>
    %51 = arith.mulf %50, %49 : vector<4x8x8xf32>
    %52 = arith.addf %51, %48 : vector<4x8x8xf32>
    %c0_38 = arith.constant 0 : index
    %c0_39 = arith.constant 0 : index
    %c0_40 = arith.constant 0 : index
    %53 = vector.load %arg18[%c0_38, %c0_39, %c0_40] : memref<4x8x8xf32, #tpu.memory_space<vmem>>, vector<4x8x8xf32>
    tpu.vector_store %arg18[%c0_38, %c0_39, %c0_40], %52 {strides = array<i32>} : memref<4x8x8xf32, #tpu.memory_space<vmem>>, vector<4x8x8xf32>,
    %c0_41 = arith.constant 0 : index
    %c0_42 = arith.constant 0 : index
    %c0_43 = arith.constant 0 : index
    %54 = vector.load %arg16[%c0_41, %c0_42, %c0_43] : memref<4x8x1xf32, #tpu.memory_space<vmem>>, vector<4x8x1xf32>
    tpu.vector_store %arg16[%c0_41, %c0_42, %c0_43], %36 {strides = array<i32>} : memref<4x8x1xf32, #tpu.memory_space<vmem>>, vector<4x8x1xf32>,
    %c0_i32_44 = arith.constant 0 : i32
    %55 = arith.cmpi eq, %arg2, %c0_i32_44 : i32
    %56 = arith.extui %55 : i1 to i32
    %c0_i32_45 = arith.constant 0 : i32
    %57 = arith.cmpi ne, %56, %c0_i32_45 : i32
    scf.if %57 {
      %c0_46 = arith.constant 0 : index
      %c0_47 = arith.constant 0 : index
      %c0_48 = arith.constant 0 : index
      %58 = vector.load %arg18[%c0_46, %c0_47, %c0_48] : memref<4x8x8xf32, #tpu.memory_space<vmem>>, vector<4x8x8xf32>
      %c0_49 = arith.constant 0 : index
      %c0_50 = arith.constant 0 : index
      %c0_51 = arith.constant 0 : index
      %59 = vector.load %arg17[%c0_49, %c0_50, %c0_51] : memref<4x8x1xf32, #tpu.memory_space<vmem>>, vector<4x8x1xf32>
      %60 = vector.broadcast %59 : vector<4x8x1xf32> to vector<4x8x8xf32>
      %61 = arith.divf %58, %60 : vector<4x8x8xf32>
      %c0_52 = arith.constant 0 : index
      %c0_53 = arith.constant 0 : index
      %c0_54 = arith.constant 0 : index
      %62 = vector.load %arg12[%c0_52, %c0_53, %c0_54] : memref<4x8x32xf32, #tpu.memory_space<vmem>>, vector<4x8x32xf32>
      %cst_55 = arith.constant dense<0.000000e+00> : vector<4x8x32xf32>
      %63 = tpu.matmul %61, %62, %cst_55 {dimension_numbers = #tpu.dot_dimension_numbers<[2], [1], [1], [2], [0, 0, 0, 1, 1, 2], [0], [0]>} : vector<4x8x8xf32>, vector<4x8x32xf32>, vector<4x8x32xf32> -> vector<4x8x32xf32>
      %cst_56 = arith.constant dense<0.000000e+00> : vector<8x32xf32>
      %64 = vector.multi_reduction <add>, %63, %cst_56 [0] : vector<4x8x32xf32> to vector<8x32xf32>
      %c0_57 = arith.constant 0 : index
      %c0_58 = arith.constant 0 : index
      %65 = vector.load %arg13[%c0_57, %c0_58] : memref<1x32xf32, #tpu.memory_space<vmem>>, vector<1x32xf32>
      %66 = vector.broadcast %65 : vector<1x32xf32> to vector<8x32xf32>
      %67 = arith.addf %64, %66 : vector<8x32xf32>
      %c0_59 = arith.constant 0 : index
      %c0_60 = arith.constant 0 : index
      %c0_61 = arith.constant 0 : index
      %68 = vector.load %arg14[%c0_59, %c0_60, %c0_61] : memref<1x8x32xf32, #tpu.memory_space<vmem>>, vector<1x8x32xf32>
      %69 = vector.shape_cast %68 : vector<1x8x32xf32> to vector<8x32xf32>
      %70 = vector.shape_cast %67 : vector<8x32xf32> to vector<1x8x32xf32>
      tpu.vector_store %arg14[%c0_59, %c0_60, %c0_61], %70 {strides = array<i32>} : memref<1x8x32xf32, #tpu.memory_space<vmem>>, vector<1x8x32xf32>,
    } else {
    }
    return
  }
  func.func @transform_0(%arg0: i32, %arg1: i32, %arg2: i32) -> (i32, i32, i32) {
    %c0_i32 = arith.constant 0 : i32
    %c0_i32_0 = arith.constant 0 : i32
    return %arg0, %arg1, %c0_i32 : i32, i32, i32
  }
  func.func @transform_1(%arg0: i32, %arg1: i32, %arg2: i32) -> (i32, i32, i32) {
    %c0_i32 = arith.constant 0 : i32
    %c0_i32_0 = arith.constant 0 : i32
    return %arg0, %arg2, %c0_i32 : i32, i32, i32
  }
  func.func @transform_2(%arg0: i32, %arg1: i32, %arg2: i32) -> (i32, i32, i32) {
    %c0_i32 = arith.constant 0 : i32
    %c0_i32_0 = arith.constant 0 : i32
    return %arg0, %arg2, %c0_i32 : i32, i32, i32
  }
  func.func @transform_3(%arg0: i32, %arg1: i32, %arg2: i32) -> (i32, i32, i32) {
    %c0_i32 = arith.constant 0 : i32
    %c0_i32_0 = arith.constant 0 : i32
    %c0_i32_1 = arith.constant 0 : i32
    %c0_i32_2 = arith.constant 0 : i32
    return %c0_i32, %c0_i32_0, %c0_i32_1 : i32, i32, i32
  }
  func.func @transform_4(%arg0: i32, %arg1: i32, %arg2: i32) -> (i32, i32, i32) {
    %c0_i32 = arith.constant 0 : i32
    %c0_i32_0 = arith.constant 0 : i32
    %c0_i32_1 = arith.constant 0 : i32
    %c0_i32_2 = arith.constant 0 : i32
    return %c0_i32, %c0_i32_0, %c0_i32_1 : i32, i32, i32
  }
  func.func @transform_5(%arg0: i32, %arg1: i32, %arg2: i32) -> (i32, i32, i32) {
    %c0_i32 = arith.constant 0 : i32
    %c0_i32_0 = arith.constant 0 : i32
    %c0_i32_1 = arith.constant 0 : i32
    %c0_i32_2 = arith.constant 0 : i32
    return %c0_i32, %c0_i32_0, %c0_i32_1 : i32, i32, i32
  }
  func.func @transform_6(%arg0: i32, %arg1: i32, %arg2: i32) -> (i32, i32, i32) {
    %c0_i32 = arith.constant 0 : i32
    %c0_i32_0 = arith.constant 0 : i32
    %c0_i32_1 = arith.constant 0 : i32
    %c0_i32_2 = arith.constant 0 : i32
    return %c0_i32, %c0_i32_0, %c0_i32_1 : i32, i32, i32
  }
  func.func @transform_7(%arg0: i32, %arg1: i32, %arg2: i32) -> (i32, i32, i32) {
    %c0_i32 = arith.constant 0 : i32
    %c0_i32_0 = arith.constant 0 : i32
    %c0_i32_1 = arith.constant 0 : i32
    %c0_i32_2 = arith.constant 0 : i32
    return %c0_i32, %c0_i32_0, %c0_i32_1 : i32, i32, i32
  }
  func.func @transform_8(%arg0: i32, %arg1: i32, %arg2: i32) -> (i32, i32, i32) {
    %c0_i32 = arith.constant 0 : i32
    %c0_i32_0 = arith.constant 0 : i32
    %c0_i32_1 = arith.constant 0 : i32
    %c0_i32_2 = arith.constant 0 : i32
    return %c0_i32, %c0_i32_0, %c0_i32_1 : i32, i32, i32
  }
  func.func @transform_9(%arg0: i32, %arg1: i32, %arg2: i32) -> (i32, i32, i32) {
    %c0_i32 = arith.constant 0 : i32
    %c0_i32_0 = arith.constant 0 : i32
    %c0_i32_1 = arith.constant 0 : i32
    %c0_i32_2 = arith.constant 0 : i32
    return %c0_i32, %c0_i32_0, %c0_i32_1 : i32, i32, i32
  }
  func.func @transform_10(%arg0: i32, %arg1: i32, %arg2: i32) -> (i32, i32) {
    %c0_i32 = arith.constant 0 : i32
    %c0_i32_0 = arith.constant 0 : i32
    %c0_i32_1 = arith.constant 0 : i32
    return %c0_i32, %c0_i32_0 : i32, i32
  }
  func.func @transform_11(%arg0: i32, %arg1: i32, %arg2: i32) -> (i32, i32, i32) {
    %c0_i32 = arith.constant 0 : i32
    %c0_i32_0 = arith.constant 0 : i32
    return %arg0, %arg1, %c0_i32 : i32, i32, i32
  }
}

</mosaic_0001>

<bundles_post_ra>
// kernel: tpu_custom_call.1
= control target key start
LH: loop header
LB: loop body
LE: loop exit
PB: predicated region body
PF: predicated region fallthrough
CT: control target
= control target key end

     0   :  { %16 = vsyncpa [#allocation7], 0  ;;  %s3317_s0 = inlined_call_operand.vmem [shape: f32[2,8,32], index: 0, kind: input, shape index: {}]   ;;  %s3318_s1 = inlined_call_operand.vmem [shape: f32[2,8,32], index: 1, kind: input, shape index: {}]   ;;  %s3319_s2 = inlined_call_operand.vmem [shape: f32[2,8,32], index: 2, kind: input, shape index: {}]   ;;  %s3320_s3 = inlined_call_operand.vmem [shape: f32[4,32,8], index: 3, kind: input, shape index: {}]   ;;  %s3321_s4 = inlined_call_operand.vmem [shape: f32[4,1,8], index: 4, kind: input, shape index: {}]   ;;  %s3322_s5 = inlined_call_operand.vmem [shape: f32[2,32,8], index: 5, kind: input, shape index: {}]   ;;  %s3323_s6 = inlined_call_operand.vmem [shape: f32[2,1,8], index: 6, kind: input, shape index: {}]   ;;  %s3324_s7 = inlined_call_operand.vmem [shape: f32[2,32,8], index: 7, kind: input, shape index: {}]   ;;  %s3325_s8 = inlined_call_operand.vmem [shape: f32[2,1,8], index: 8, kind: input, shape index: {}]   ;;  %s3326_s9 = inlined_call_operand.vmem [shape: f32[4,8,32], index: 9, kind: input, shape index: {}]   ;;  %s3327_s10 = inlined_call_operand.vmem [shape: f32[1,32], index: 10, kind: input, shape index: {}]   ;;  %s3328_s11 = inlined_call_operand.hbm [shape: f32[2,8,32], index: 11, kind: output, shape index: {}]  }
   0x1   :  { %18 = vsyncpa [#allocation7 + $0x1], 0  ;;  %s2894_s17 = smov 0   ;;  %s2896_s18 = smov 0  }
   0x2   :  { %s2898_s19 = smov 0   ;;  %s2900_s20 = smov 0  }
   0x3   :  { %s2902_s21 = smov 0   ;;  %s2904_s22 = smov 0  }
   0x4 LB: > { %3331 = sst [smem:[#allocation9_spill]] %s2822_s21  ;;  %s2356_s23 = sadd.s32 4294967295, %s2826_s22   ;;  %s2826_s22 = sphi %s2904_s22, %s24_s22   ;;  %s2822_s21 = sphi %s2902_s21, %s3336_s21   ;;  %s2818_s20 = sphi %s2900_s20, %s3335_s20   ;;  %s2814_s19 = sphi %s2898_s19, %s3339_s19   ;;  %s2810_s18 = sphi %s2896_s18, %s3338_s18   ;;  %s2806_s17 = sphi %s2894_s17, %s3337_s17  }
   0x5   : > { %s2357_s24 = sadd.s32 4294967294, %s2826_s22   ;;  %s43_s25 = sadd.s32 1, %s2822_s21 }
   0x6   : > { %s304_s26 = sadd.s32 1, %s2814_s19  ;;  %p45_p0 = scmp.ge.s32.totalorder %s43_s25, 2 }
   0x7   : > { %p314_p1 = scmp.ne.s32.totalorder %s2814_s19, %s2810_s18  ;;  %p315_p2 = scmp.eq.s32.totalorder %s2356_s23, 1 }
   0x8   : > { %p320_p3 = scmp.ne.s32.totalorder %s2810_s18, %s2806_s17  ;;  %s3341_s25 = smov (%p45_p0, %s43_s25), 0 }
   0x9   : > { %3332 = sst [smem:[#allocation10_spill]] %s3341_s25  ;;  %p2934_p4 = por %p315_p2, %p314_p1 }
   0xa   : > { %p321_p5 = scmp.eq.s32.totalorder %s2357_s24, 1  ;;  %s299_s28 = ssub.s32 %s2822_s21, %s3341_s25 }
   0xb   : > { %p2360_p6 = scmp.ge.s32.totalorder %s2826_s22, 1  ;;  %p302_p7 = scmp.eq.s32.totalorder %s299_s28, 0 }
   0xc   : > { %p2941_p8 = por %p321_p5, %p320_p3  ;;  %p393_p9 = scmp.lt.s32.totalorder %s2826_s22, 3 }
   0xd   : > { %s2947_s30 = scalar_select %p302_p7, %s2814_s19, %s304_s26  }
   0xe   : > { %p394_p10 = pnand %p2360_p6, %p393_p9 }
   0xf   : > { %v475_v0 = vld [vmem:[%s3320_s3] sm:$0xff] (!%p394_p10)  ;;  %v476_v1 = vld [vmem:[%s3320_s3 + $0x8] sm:$0xff] (!%p394_p10)  ;;  %v477_v2 = vld [vmem:[%s3320_s3 + $0x10] sm:$0xff] (!%p394_p10)  ;;  %v2828_v3 = vmov (!%p394_p10), 0.0|0.0   ;;  %p449_p11 = scmp.lt.s32.totalorder (!%p394_p10), %s2818_s20, 1  ;;  %vm2829_vm0 = vmmov (!%p394_p10), 0  }
  0x10   : > { %397 = sbr.rel (%p394_p10) target bundleno = 1298 (0x512), region = 64  ;;  %2614 = vmatprep.subr.bf16.mxu0 (!%p394_p10), %v2828_v3  ;;  %v2615_v4 = vpack.c.bf16 (!%p394_p10), %v476_v1, %v475_v0  ;;  %2620 = vmatprep.subr.bf16.mxu1 (!%p394_p10), %v2828_v3  ;;  %v478_v5 = vld [vmem:[%s3320_s3 + $0x18] sm:$0xff] (!%p394_p10)  ;;  %v479_v6 = vld [vmem:[%s3320_s3 + $0x20] sm:$0xff] (!%p394_p10)  ;;  %v480_v7 = vld [vmem:[%s3320_s3 + $0x28] sm:$0xff] (!%p394_p10)  ;;  %v2830_v9 = vmov (!%p394_p10), 0.0   ;;  %vm519_vm1 = vcmask (!%p394_p10), 261120  }
  0x11   : > { %v2621_v8 = vpack.c.bf16 (!%p394_p10), %v480_v7, %v479_v6  ;;  %2474 = vmatprep.mubr.msk.f32.mxu0 (!%p394_p10), %vm2829_vm0, %v2830_v9  ;;  %v481_v10 = vld [vmem:[%s3320_s3 + $0x30] sm:$0xff] (!%p394_p10)  ;;  %v482_v11 = vld [vmem:[%s3320_s3 + $0x38] sm:$0xff] (!%p394_p10)  ;;  %2485 = vmatprep.mubr.msk.f32.mxu1 (!%p394_p10), %vm2829_vm0, %v2830_v9  ;;  %v2618_v12 = vpack.c.bf16 (!%p394_p10), %v478_v5, %v477_v2  ;;  %v483_v14 = vld [vmem:[%s3320_s3 + $0x40] sm:$0xff] (!%p394_p10)  ;;  %vm807_vm2 = vcmask (!%p394_p10), 64512   ;;  %vm812_vm3 = vcmask (!%p394_p10), 7168   ;;  %s446_s28 = sand.u32 (!%p394_p10), 1, %s2810_s18  }
  0x12   : > { %2616 = vmatpush3.bf16.msra.mxu0 (!%p394_p10), %v2615_v4  ;;  %v2624_v13 = vpack.c.bf16 (!%p394_p10), %v482_v11, %v481_v10  ;;  %v484_v15 = vld [vmem:[%s3320_s3 + $0x48] sm:$0xff] (!%p394_p10)  ;;  %v487_v16 = vld [vmem:[%s3320_s3 + $0x60] sm:$0xff] (!%p394_p10)  ;;  %v485_v20 = vld [vmem:[%s3320_s3 + $0x50] sm:$0xff] (!%p394_p10)  ;;  %821 = vst.msk [vmem:[#allocation5] sm:$0xff] (!%p394_p10), %vm807_vm2, %v2830_v9  ;;  %s2399_s13 = sshll.u32 (!%p394_p10), %s2818_s20, 7  ;;  %s2238_s24 = scalar_lea.sflag (!%p394_p10), [#allocation7], %s446_s28 }
  0x13   : > { %2617 = vmatprep.subr.bf16.mxu0 (!%p394_p10), %v2828_v3  ;;  %2622 = vmatpush3.bf16.msra.mxu1 (!%p394_p10), %v2621_v8  ;;  %v488_v17 = vld [vmem:[%s3320_s3 + $0x68] sm:$0xff] (!%p394_p10)  ;;  %v2627_v19 = vpack.c.bf16 (!%p394_p10), %v484_v15, %v483_v14  ;;  %v486_v21 = vld [vmem:[%s3320_s3 + $0x58] sm:$0xff] (!%p394_p10)  ;;  %v489_v23 = vld [vmem:[%s3320_s3 + $0x70] sm:$0xff] (!%p394_p10)  ;;  %822 = vst.msk [vmem:[#allocation5 + $0x8] sm:$0xff] (!%p394_p10), %vm807_vm2, %v2830_v9 }
  0x14   : > { %2623 = vmatprep.subr.bf16.mxu1 (!%p394_p10), %v2828_v3  ;;  %v2633_v22 = vpack.c.bf16 (!%p394_p10), %v488_v17, %v487_v16  ;;  %v490_v24 = vld [vmem:[%s3320_s3 + $0x78] sm:$0xff] (!%p394_p10)  ;;  %v2630_v25 = vpack.c.bf16 (!%p394_p10), %v486_v21, %v485_v20  ;;  %v827_v27 = vld [vmem:[%s3322_s5] sm:$0xff] (!%p394_p10)  ;;  %v828_v28 = vld [vmem:[%s3322_s5 + $0x8] sm:$0xff] (!%p394_p10)  ;;  %823 = vst.msk [vmem:[#allocation5 + $0x10] sm:$0xff] (!%p394_p10), %vm807_vm2, %v2830_v9 }
  0x15   : > { %v2636_v26 = vpack.c.bf16 (!%p394_p10), %v490_v24, %v489_v23  ;;  %v831_v29 = vld [vmem:[%s3322_s5 + $0x20] sm:$0xff] (!%p394_p10)  ;;  %v832_v30 = vld [vmem:[%s3322_s5 + $0x28] sm:$0xff] (!%p394_p10)  ;;  %v2639_v31 = vpack.c.bf16 (!%p394_p10), %v828_v28, %v827_v27  ;;  %v829_v32 = vld [vmem:[%s3322_s5 + $0x10] sm:$0xff] (!%p394_p10)  ;;  %824 = vst.msk [vmem:[#allocation5 + $0x18] sm:$0xff] (!%p394_p10), %vm807_vm2, %v2830_v9  ;;  %v2831_v28 = vmov (!%p394_p10), -inf  }
  0x16   : > { %2619 = vmatpush3.bf16.msra.mxu0 (!%p394_p10), %v2618_v12  ;;  %v830_v33 = vld [vmem:[%s3322_s5 + $0x18] sm:$0xff] (!%p394_p10)  ;;  %v2645_v34 = vpack.c.bf16 (!%p394_p10), %v832_v30, %v831_v29  ;;  %v833_v35 = vld [vmem:[%s3322_s5 + $0x30] sm:$0xff] (!%p394_p10)  ;;  %v993_v40 = vld [vmem:[%s3324_s7] sm:$0xff] (!%p394_p10)  ;;  %813 = vst.msk [vmem:[#allocation3] sm:$0xff] (!%p394_p10), %vm812_vm3, %v2831_v28 }
  0x17   : > { %s450_s26 = scalar_select %p449_p11, %s2818_s20, 1  ;;  %2626 = vmatprep.subr.bf16.mxu0 %v2828_v3  ;;  %2625 = vmatpush3.bf16.msra.mxu1 %v2624_v13  ;;  %v834_v36 = vld [vmem:[%s3322_s5 + $0x38] sm:$0xff]  ;;  %v2642_v37 = vpack.c.bf16 %v830_v33, %v829_v32  ;;  %v994_v41 = vld [vmem:[%s3324_s7 + $0x8] sm:$0xff]  ;;  %v997_v42 = vld [vmem:[%s3324_s7 + $0x20] sm:$0xff]  ;;  %814 = vst.msk [vmem:[#allocation3 + $0x8] sm:$0xff] %vm812_vm3, %v2831_v28 }
  0x18   : > { %2632 = vmatprep.subr.bf16.mxu1 %v2828_v3  ;;  %v2648_v38 = vpack.c.bf16 %v834_v36, %v833_v35  ;;  %v2651_v43 = vpack.c.bf16 %v994_v41, %v993_v40  ;;  %v998_v44 = vld [vmem:[%s3324_s7 + $0x28] sm:$0xff]  ;;  %v995_v46 = vld [vmem:[%s3324_s7 + $0x10] sm:$0xff]  ;;  %v996_v47 = vld [vmem:[%s3324_s7 + $0x18] sm:$0xff]  ;;  %815 = vst.msk [vmem:[#allocation3 + $0x10] sm:$0xff] %vm812_vm3, %v2831_v28  ;;  %v2832_v41 = vmov 0   ;;  %s2833_s20 = smov [#allocation6]  }
  0x19   : > { %s2988_s15 = sshll.u32 %s450_s26, 3  ;;  %v2657_v45 = vpack.c.bf16 %v998_v44, %v997_v42  ;;  %v999_v48 = vld [vmem:[%s3324_s7 + $0x30] sm:$0xff]  ;;  %v2654_v49 = vpack.c.bf16 %v996_v47, %v995_v46  ;;  %v1000_v50 = vld [vmem:[%s3324_s7 + $0x38] sm:$0xff]  ;;  %v2365_v53 = vld [vmem:[%s3321_s4] ss:$0 sm:$0xff]  ;;  %816 = vst.msk [vmem:[#allocation3 + $0x18] sm:$0xff] %vm812_vm3, %v2831_v28  ;;  %2722 = vset.pattern.permute.xlu0 %v2832_v41  ;;  %2723 = vset.pattern.permute.xlu1 %v2832_v41 }
  0x1a   : > { %s455_s12 = scalar_lea.vmem %s3317_s0, %s2988_s15  ;;  %s462_s23 = scalar_lea.vmem %s3318_s1, %s2988_s15  ;;  %v2660_v51 = vpack.c.bf16 %v1000_v50, %v999_v48  ;;  %v2366_v54 = vld [vmem:[%s3321_s4 + $0x1] ss:$0 sm:$0xff]  ;;  %v2367_v63 = vld [vmem:[%s3321_s4 + $0x2] ss:$0 sm:$0xff]  ;;  %v2368_v0 = vld [vmem:[%s3321_s4 + $0x3] ss:$0 sm:$0xff] }
  0x1b   : > { %v474_v18 = vld [vmem:[%s455_s12] sm:$0xff]  ;;  %s469_s25 = scalar_lea.vmem %s3319_s2, %s2988_s15  ;;  %817 = vst.msk [vmem:[#allocation4] sm:$0xff] %vm812_vm3, %v2830_v9  ;;  %818 = vst.msk [vmem:[#allocation4 + $0x8] sm:$0xff] %vm812_vm3, %v2830_v9  ;;  %s2361_s12 = sshll.u32 %s446_s28, 3 }
  0x1c   : > { %2475 = vmatmul.mubr.msk.f32.vlgmr.msra.gmra.mrb[0].mxu0 %vm519_vm1, %v474_v18  ;;  %2486 = vmatmul.mubr.msk.f32.vlgmr.msra.gmra.mrb[0].mxu1 %vm519_vm1, %v474_v18  ;;  %v825_v39 = vld [vmem:[%s462_s23] sm:$0xff]  ;;  %819 = vst.msk [vmem:[#allocation4 + $0x10] sm:$0xff] %vm812_vm3, %v2830_v9  ;;  %820 = vst.msk [vmem:[#allocation4 + $0x18] sm:$0xff] %vm812_vm3, %v2830_v9  ;;  %s448_s14 = scalar_lea.vmem [#allocation6], %s2361_s12  ;;  %s3269_s23 = scalar_lea.hbm %s3328_s11, %s2399_s13 }
  0x1d   : > { %2628 = vmatpush3.bf16.msra.mxu0 %v2627_v19  ;;  %2634 = vmatpush3.bf16.msra.mxu1 %v2633_v22  ;;  %v826_v52 = vld [vmem:[%s469_s25] sm:$0xff]  ;;  %s2252_s16 = sshll.u32 %s448_s14, 4  ;;  %s2752_s12 = sshll.u32 %s2833_s20, 4  ;;  %s3271_s16 = int_to_ptr.vmem [resolvable:$true] %s2252_s16  ;;  %s2753_s12 = int_to_ptr.vmem [resolvable:$false] %s2752_s12 }
  0x1e   : > { %2629 = vmatprep.subr.bf16.mxu0 %v2828_v3  ;;  %2496 = vmatprep.mubr.msk.f32.mxu0 %vm2829_vm0, %v2830_v9  ;;  %v2373_v10 = vld [vmem:[%s3323_s6] ss:$0 sm:$0xff]  ;;  %v2374_v12 = vld [vmem:[%s3323_s6 + $0x1] ss:$0 sm:$0xff]  ;;  %s2748_s15 = scalar_lea.vmem %s3271_s16, 128  ;;  %s2754_s26 = scalar_lea.vmem %s2753_s12, 256 }
  0x1f   : > { %2635 = vmatprep.subr.bf16.mxu1 %v2828_v3  ;;  %2507 = vmatprep.mubr.msk.f32.mxu1 %vm2829_vm0, %v2830_v9  ;;  %v2377_v22 = vld [vmem:[%s3325_s8] ss:$0 sm:$0xff]  ;;  %v3187_v46 = vld [vmem:[#allocation3 + $0x10] sm:$0xff]  ;;  %p2749_p12 = scmp.ne.s32.totalorder %s3271_s16, %s2748_s15  ;;  %p2755_p1 = scmp.lt.s32.totalorder %s3271_s16, %s2753_s12 }
  0x20   : > { %v3180_v42 = vld [vmem:[#allocation3] sm:$0xff]  ;;  %p2756_p2 = scmp.lt.s32.totalorder %s2754_s26, %s2748_s15 }
  0x21   : > { %2631 = vmatpush3.bf16.msra.mxu0 %v2630_v25  ;;  %2637 = vmatpush3.bf16.msra.mxu1 %v2636_v26  ;;  %p2750_p13 = pnand %p2749_p12, %p2934_p4 }
  0x22   : > { %2638 = vmatprep.subr.bf16.mxu0 %v2828_v3  ;;  %2644 = vmatprep.subr.bf16.mxu1 %v2828_v3  ;;  %p2757_p3 = por %p2756_p2, %p2755_p1 }
  0x23   : > { %p2751_p0 = pneg %p2750_p13 }
  0x24   : > { %2497 = vmatmul.mubr.msk.f32.vlgmr.msra.gmra.mrb[2].mxu0 %vm519_vm1, %v474_v18  ;;  %2508 = vmatmul.mubr.msk.f32.vlgmr.msra.gmra.mrb[2].mxu1 %vm519_vm1, %v474_v18 }
  0x25   : > { %2640 = vmatpush3.bf16.msra.mxu0 %v2639_v31  ;;  %2646 = vmatpush3.bf16.msra.mxu1 %v2645_v34  ;;  %p2758_p5 = pnand %p2757_p3, %p2751_p0 }
  0x26   : > { %2641 = vmatprep.subr.bf16.mxu0 %v2828_v3  ;;  %2518 = vmatprep.mubr.msk.f32.mxu0 %vm2829_vm0, %v2830_v9 }
  0x27   : > { %2647 = vmatprep.subr.bf16.mxu1 %v2828_v3  ;;  %2529 = vmatprep.mubr.msk.f32.mxu1 %vm2829_vm0, %v2830_v9 }
  0x29   : > { %2643 = vmatpush3.bf16.msra.mxu0 %v2642_v37  ;;  %2649 = vmatpush3.bf16.msra.mxu1 %v2648_v38 }
  0x2a   : > { %2650 = vmatprep.subr.bf16.mxu0 %v2828_v3  ;;  %2656 = vmatprep.subr.bf16.mxu1 %v2828_v3 }
  0x2c   : > { %2519 = vmatmul.mubr.msk.f32.vlgmr.msra.gmra.mrb[4].mxu0 %vm519_vm1, %v825_v39  ;;  %2530 = vmatmul.mubr.msk.f32.vlgmr.msra.gmra.mrb[4].mxu1 %vm519_vm1, %v825_v39 }
  0x2d   : > { %2540 = vmatprep.mubr.msk.f32.mxu0 %vm2829_vm0, %v2830_v9  ;;  %2551 = vmatprep.mubr.msk.f32.mxu1 %vm2829_vm0, %v2830_v9 }
  0x2e   : > { %2652 = vmatpush3.bf16.msra.mxu0 %v2651_v43  ;;  %2658 = vmatpush3.bf16.msra.mxu1 %v2657_v45  ;;  %v3185_v45 = vld [vmem:[#allocation3 + $0x8] sm:$0xff] }
  0x2f   : > { %2653 = vmatprep.subr.bf16.mxu0 %v2828_v3  ;;  %2659 = vmatprep.subr.bf16.mxu1 %v2828_v3 }
  0x32   : > { %2655 = vmatpush3.bf16.msra.mxu0 %v2654_v49  ;;  %2661 = vmatpush3.bf16.msra.mxu1 %v2660_v51 }
  0x33   : > { %2554 = vmatprep.subr.mxu0 %v2830_v9  ;;  %2559 = vmatprep.subr.mxu1 %v2830_v9 }
  0x35   : > { %2541 = vmatmul.mubr.msk.f32.vlgmr.msra.gmra.mrb[6].mxu0 %vm519_vm1, %v826_v52  ;;  %2552 = vmatmul.mubr.msk.f32.vlgmr.msra.gmra.mrb[6].mxu1 %vm519_vm1, %v826_v52  ;;  %v3196_v52 = vld [vmem:[#allocation3 + $0x18] sm:$0xff] }
  0x36   : > { %2556 = vmatprep.mubr.msk.f32.mxu0 %vm2829_vm0, %v2830_v9  ;;  %2561 = vmatprep.mubr.msk.f32.mxu1 %vm2829_vm0, %v2830_v9 }
  0xef   : > { %v589_v55 = vpop.f32.mrb[0].mxu0  ;;  %v659_v58 = vpop.f32.mrb[0].mxu1 }
  0xf0   : > { %v590_v56 = vadd.f32 %v2365_v53, %v589_v55  ;;  %v2476_v57 = vpop.f32.mrb[1].mxu0  ;;  %v660_v59 = vadd.f32 %v2366_v54, %v659_v58  ;;  %v2487_v60 = vpop.f32.mrb[1].mxu1 }
  0xf2   : > { %v803_v61 = vmul.f32 0.35355338, %v590_v56  ;;  %v804_v62 = vmul.f32 0.35355338, %v660_v59 }
  0xf4   : > { %808 = vst.msk [vmem:[#allocation2] sm:$0xff] %vm807_vm2, %v803_v61  ;;  %809 = vst.msk [vmem:[#allocation2 + $0x8] sm:$0xff] %vm807_vm2, %v804_v62 }
  0xf7   : > { %v729_v1 = vpop.f32.mrb[2].mxu0  ;;  %v799_v4 = vpop.f32.mrb[2].mxu1 }
  0xf8   : > { %v730_v2 = vadd.f32 %v2367_v63, %v729_v1  ;;  %v2498_v3 = vpop.f32.mrb[3].mxu0  ;;  %v800_v5 = vadd.f32 %v2368_v0, %v799_v4  ;;  %v2509_v6 = vpop.f32.mrb[3].mxu1 }
  0xf9   : > { %v2378_v3 = vld [vmem:[%s3325_s8 + $0x1] ss:$0 sm:$0xff] }
  0xfa   : > { %v805_v7 = vmul.f32 0.35355338, %v730_v2  ;;  %v806_v8 = vmul.f32 0.35355338, %v800_v5 }
  0xfb   : > { %v1159_v18 = vld [vmem:[#allocation2 + $0x8] sm:$0xff]  ;;  %v1158_v19 = vld [vmem:[#allocation2] sm:$0xff] }
  0xfc   : > { %810 = vst.msk [vmem:[#allocation2 + $0x10] sm:$0xff] %vm807_vm2, %v805_v7  ;;  %811 = vst.msk [vmem:[#allocation2 + $0x18] sm:$0xff] %vm807_vm2, %v806_v8 }
  0xff   : > { %v919_v11 = vpop.f32.mrb[4].mxu0  ;;  %v989_v15 = vpop.f32.mrb[4].mxu1 }
 0x100   : > { %v920_v13 = vadd.f32 %v2373_v10, %v919_v11  ;;  %v2520_v14 = vpop.f32.mrb[5].mxu0  ;;  %v2531_v16 = vpop.f32.mrb[5].mxu1  ;;  %v990_v17 = vadd.f32 %v2374_v12, %v989_v15 }
 0x102   : > { %2555 = vmatpush3.xpose.msk.msra.mxu0 %vm807_vm2, %v920_v13  ;;  %2560 = vmatpush3.xpose.msk.msra.mxu1 %vm807_vm2, %v920_v13 }
 0x103   : > { %2564 = vmatprep.subr.mxu0 %v2830_v9  ;;  %2569 = vmatprep.subr.mxu1 %v2830_v9  ;;  %v1161_v20 = vld [vmem:[#allocation2 + $0x18] sm:$0xff]  ;;  %v1160_v21 = vld [vmem:[#allocation2 + $0x10] sm:$0xff] }
 0x105   : > { %2557 = vmatmul.mubr.msk.f32.vlgmr.msra.gmra.mrb[8].mxu0 %vm807_vm2, %v1158_v19  ;;  %2562 = vmatmul.mubr.msk.f32.vlgmr.msra.gmra.mrb[8].mxu1 %vm807_vm2, %v1159_v18 }
 0x106   : > { %2565 = vmatpush3.xpose.msk.msra.mxu0 %vm807_vm2, %v990_v17  ;;  %2566 = vmatprep.mubr.msk.f32.mxu0 %vm2829_vm0, %v2830_v9 }
 0x107   : > { %2570 = vmatpush3.xpose.msk.msra.mxu1 %vm807_vm2, %v990_v17  ;;  %2571 = vmatprep.mubr.msk.f32.mxu1 %vm2829_vm0, %v2830_v9 }
 0x108   : > { %2574 = vmatprep.subr.mxu0 %v2830_v9  ;;  %2579 = vmatprep.subr.mxu1 %v2830_v9  ;;  %v1084_v23 = vpop.f32.mrb[6].mxu0  ;;  %v3160_v24 = vpop.f32.mrb[6].mxu1 }
 0x109   : > { %2567 = vmatmul.mubr.msk.f32.vlgmr.msra.gmra.mrb[10].mxu0 %vm807_vm2, %v1160_v21  ;;  %v1085_v25 = vadd.f32 %v2377_v22, %v1084_v23  ;;  %v2542_v26 = vpop.f32.mrb[7].mxu0  ;;  %v2553_v27 = vpop.f32.mrb[7].mxu1  ;;  %v1155_v7 = vadd.f32 %v2378_v3, %v3160_v24  ;;  %v1525_v24 = vld [vmem:[#allocation4] sm:$0xff] }
 0x10a   : > { %2572 = vmatmul.mubr.msk.f32.vlgmr.msra.gmra.mrb[10].mxu1 %vm807_vm2, %v1161_v20  ;;  %2576 = vmatprep.mubr.msk.f32.mxu0 %vm2829_vm0, %v2830_v9  ;;  %v1526_v27 = vld [vmem:[#allocation4 + $0x8] sm:$0xff] }
 0x10b   : > { %2581 = vmatprep.mubr.msk.f32.mxu1 %vm2829_vm0, %v2830_v9  ;;  %2575 = vmatpush3.msra.mxu0 %v1085_v25 }
 0x10c   : > { %2580 = vmatpush3.msra.mxu1 %v1085_v25  ;;  %2584 = vmatprep.subr.mxu0 %v2830_v9 }
 0x10d   : > { %2589 = vmatprep.subr.mxu1 %v2830_v9 }
 0x1d8   : > { %v1235_v29 = vpop.f32.mrb[8].mxu0  ;;  %v1308_v30 = vpop.f32.mrb[8].mxu1 }
 0x1d9   : > { %v2558_v31 = vpop.f32.mrb[9].mxu0  ;;  %v2563_v32 = vpop.f32.mrb[9].mxu1  ;;  %v1465_v33 = vsel %vm807_vm2, %v1235_v29, -inf  ;;  %v1468_v36 = vsel %vm807_vm2, %v1308_v30, -inf }
 0x1da   : > { %1466 = vmax.xlane.f32.xlu0 %v1465_v33  ;;  %v1527_v31 = vld [vmem:[#allocation4 + $0x10] sm:$0xff] }
 0x1dc   : > { %v1384_v34 = vpop.f32.mrb[10].mxu0 }
 0x1dd   : > { %v2568_v35 = vpop.f32.mrb[11].mxu0  ;;  %v1471_v37 = vsel %vm807_vm2, %v1384_v34, -inf  ;;  %v1457_v38 = vpop.f32.mrb[10].mxu1 }
 0x1de   : > { %1469 = vmax.xlane.f32.xlu0 %v1468_v36  ;;  %1472 = vmax.xlane.f32.xlu1 %v1471_v37  ;;  %v2573_v39 = vpop.f32.mrb[11].mxu1  ;;  %v1474_v40 = vsel %vm807_vm2, %v1457_v38, -inf  ;;  %v1528_v36 = vld [vmem:[#allocation4 + $0x18] sm:$0xff] }
 0x1e2   : > { %1475 = vmax.xlane.f32.xlu1 %v1474_v40 }
 0x267   : > { %v1467_v43 = vpop.xlane.xlu0 %1466 }
 0x268   : > { %v3183_v44 = vmax.f32 %v3180_v42, %v1467_v43 }
 0x26a   : > { %v1481_v47 = vsub.f32 %v3180_v42, %v3183_v44  ;;  %1882 = vst.msk [vmem:[#allocation3] sm:$0xff] %vm812_vm3, %v3183_v44  ;;  %1495 = vperm.xlu0 %2722, %v3183_v44  }
 0x26b   : > { %v1470_v48 = vpop.xlane.xlu0 %1469  ;;  %v1473_v49 = vpop.xlane.xlu1 %1472 }
 0x26c   : > { %v1478_v50 = vmax.f32 %v3185_v45, %v1470_v48  ;;  %v1479_v51 = vmax.f32 %v3187_v46, %v1473_v49  ;;  %v1485_v17 = vmul.f32 1.442695, %v1481_v47  ;;  %v1846_v48 = vld [vmem:[#allocation5] sm:$0xff] }
 0x26e   : > { %v1482_v53 = vsub.f32 %v3185_v45, %v1478_v50  ;;  %1883 = vst.msk [vmem:[#allocation3 + $0x8] sm:$0xff] %vm812_vm3, %v1478_v50  ;;  %v1483_v54 = vsub.f32 %v3187_v46, %v1479_v51  ;;  %1884 = vst.msk [vmem:[#allocation3 + $0x10] sm:$0xff] %vm812_vm3, %v1479_v51  ;;  %1500 = vperm.xlu1 %2723, %v1478_v50   ;;  %v1925_v45 = vld [vmem:[%s3326_s9] sm:$0xff]  ;;  %v1926_v46 = vld [vmem:[%s3326_s9 + $0x8] sm:$0xff] }
 0x26f   : > { %v1476_v55 = vpop.xlane.xlu1 %1475 }
 0x270   : > { %v1480_v56 = vmax.f32 %v3196_v52, %v1476_v55  ;;  %v1487_v18 = vmul.f32 1.442695, %v1482_v53  ;;  %v1489_v19 = vmul.f32 1.442695, %v1483_v54 }
 0x272   : > { %v1484_v57 = vsub.f32 %v3196_v52, %v1480_v56  ;;  %1885 = vst.msk [vmem:[#allocation3 + $0x18] sm:$0xff] %vm812_vm3, %v1480_v56  ;;  %1505 = vperm.xlu1 %2723, %v1479_v51   ;;  %v1847_v51 = vld [vmem:[#allocation5 + $0x8] sm:$0xff] }
 0x274   : > { %v1491_v23 = vmul.f32 1.442695, %v1484_v57 }
 0x276   : > { %1510 = vperm.xlu1 %2723, %v1480_v56   ;;  %v1848_v56 = vld [vmem:[#allocation5 + $0x10] sm:$0xff] }
 0x2e9   : > { %v1496_v58 = vpop.permute.xlu0 %1495 }
 0x2ea   : > { %v1513_v59 = vsub.f32 %v1235_v29, %v1496_v58 }
 0x2ec   : > { %v1517_v60 = vmul.f32 1.442695, %v1513_v59 }
 0x2ed   : > { %v1501_v61 = vpop.permute.xlu1 %1500 }
 0x2ee   : > { %2724 = vpow2.f32 %v1517_v60  ;;  %v1514_v62 = vsub.f32 %v1308_v30, %v1501_v61 }
 0x2f0   : > { %v1519_v63 = vmul.f32 1.442695, %v1514_v62 }
 0x2f1   : > { %v1506_v0 = vpop.permute.xlu1 %1505 }
 0x2f2   : > { %2726 = vpow2.f32 %v1519_v63  ;;  %v1515_v1 = vsub.f32 %v1384_v34, %v1506_v0 }
 0x2f4   : > { %v1521_v2 = vmul.f32 1.442695, %v1515_v1 }
 0x2f5   : > { %v1511_v4 = vpop.permute.xlu1 %1510 }
 0x2f6   : > { %2728 = vpow2.f32 %v1521_v2  ;;  %v1516_v5 = vsub.f32 %v1457_v38, %v1511_v4 }
 0x2f8   : > { %v2725_v6 = vpop.eup %2724  ;;  %v1523_v8 = vmul.f32 1.442695, %v1516_v5  ;;  %v1849_v5 = vld [vmem:[#allocation5 + $0x18] sm:$0xff] }
 0x2f9   : > { %2577 = vmatmul.mubr.msk.f32.vlgmr.msra.gmra.mrb[12].mxu0 %vm807_vm2, %v2725_v6  ;;  %v1533_v10 = vsel %vm807_vm2, %v2725_v6, 0.0 }
 0x2fa   : > { %2730 = vpow2.f32 %v1523_v8  ;;  %2585 = vmatpush3.msra.mxu0 %v1155_v7  ;;  %1534 = vadd.xlane.f32.xlu1 %v1533_v10 }
 0x2fb   : > { %2586 = vmatprep.mubr.msk.f32.mxu0 %vm2829_vm0, %v2830_v9  ;;  %2594 = vmatprep.subr.mxu0 %v2830_v9  ;;  %2732 = vpow2.f32 %v1485_v17 }
 0x2fc   : > { %v2727_v11 = vpop.eup %2726  ;;  %2734 = vpow2.f32 %v1487_v18 }
 0x2fd   : > { %2582 = vmatmul.mubr.msk.f32.vlgmr.msra.gmra.mrb[12].mxu1 %vm807_vm2, %v2727_v11  ;;  %v1536_v12 = vsel %vm807_vm2, %v2727_v11, 0.0  ;;  %2736 = vpow2.f32 %v1489_v19  ;;  %v1928_v19 = vld [vmem:[%s3326_s9 + $0x18] sm:$0xff] }
 0x2fe   : > { %2590 = vmatpush3.msra.mxu1 %v1155_v7  ;;  %1537 = vadd.xlane.f32.xlu0 %v1536_v12  ;;  %2738 = vpow2.f32 %v1491_v23 }
 0x2ff   : > { %2591 = vmatprep.mubr.msk.f32.mxu1 %vm2829_vm0, %v2830_v9  ;;  %2599 = vmatprep.subr.mxu1 %v2830_v9 }
 0x300   : > { %v2729_v13 = vpop.eup %2728 }
 0x301   : > { %2587 = vmatmul.mubr.msk.f32.vlgmr.msra.gmra.mrb[14].mxu0 %vm807_vm2, %v2729_v13  ;;  %v1539_v14 = vsel %vm807_vm2, %v2729_v13, 0.0 }
 0x302   : > { %1540 = vadd.xlane.f32.xlu1 %v1539_v14  ;;  %2596 = vmatprep.mubr.msk.f32.mxu0 %vm2829_vm0, %v2830_v9 }
 0x303   : > { %2595 = vmatpush3.msra.mxu0 %v1925_v45 }
 0x304   : > { %v2731_v15 = vpop.eup %2730  ;;  %2604 = vmatprep.subr.mxu0 %v2830_v9 }
 0x305   : > { %2592 = vmatmul.mubr.msk.f32.vlgmr.msra.gmra.mrb[14].mxu1 %vm807_vm2, %v2731_v15  ;;  %v1542_v16 = vsel %vm807_vm2, %v2731_v15, 0.0  ;;  %v2733_v20 = vpop.eup %2732  ;;  %v1927_v15 = vld [vmem:[%s3326_s9 + $0x10] sm:$0xff] }
 0x306   : > { %1543 = vadd.xlane.f32.xlu1 %v1542_v16  ;;  %2601 = vmatprep.mubr.msk.f32.mxu1 %vm2829_vm0, %v2830_v9  ;;  %v2735_v21 = vpop.eup %2734  ;;  %v1529_v25 = vmul.f32 %v2733_v20, %v1525_v24 }
 0x307   : > { %v2737_v22 = vpop.eup %2736  ;;  %v1530_v29 = vmul.f32 %v2735_v21, %v1526_v27  ;;  %2600 = vmatpush3.msra.mxu1 %v1926_v46 }
 0x308   : > { %v1531_v33 = vmul.f32 %v2737_v22, %v1527_v31  ;;  %v2739_v34 = vpop.eup %2738  ;;  %2609 = vmatprep.subr.mxu1 %v2830_v9 }
 0x309   : > { %v1532_v39 = vmul.f32 %v2739_v34, %v1528_v36 }
 0x317   : > { %1852 = vperm.xlu1 %2723, %v2733_v20  }
 0x31b   : > { %1857 = vperm.xlu1 %2723, %v2735_v21  }
 0x31f   : > { %1862 = vperm.xlu1 %2723, %v2737_v22  }
 0x387   : > { %v1535_v26 = vpop.xlane.xlu1 %1534 }
 0x388   : > { %v1545_v28 = vadd.f32 %v1535_v26, %v1529_v25 }
 0x38a   : > { %1550 = vst.msk [vmem:[#allocation4] sm:$0xff] %vm812_vm3, %v1545_v28 }
 0x38b   : > { %v1538_v30 = vpop.xlane.xlu0 %1537 }
 0x38c   : > { %v1546_v32 = vadd.f32 %v1538_v30, %v1530_v29 }
 0x38e   : > { %1551 = vst.msk [vmem:[#allocation4 + $0x8] sm:$0xff] %vm812_vm3, %v1546_v32 }
 0x38f   : > { %v1541_v35 = vpop.xlane.xlu1 %1540 }
 0x390   : > { %v1547_v37 = vadd.f32 %v1541_v35, %v1531_v33 }
 0x391   : > { %v1893_v38 = vld [vmem:[#allocation4] sm:$0xff] }
 0x392   : > { %1552 = vst.msk [vmem:[#allocation4 + $0x10] sm:$0xff] %vm812_vm3, %v1547_v37  ;;  %1899 = vperm.xlu0 %2722, %v1893_v38   ;;  %v2397_v38 = vld [vmem:[%s3327_s10] ss:$0 sm:$0xff] }
 0x393   : > { %v1544_v40 = vpop.xlane.xlu1 %1543 }
 0x394   : > { %v1548_v41 = vadd.f32 %v1544_v40, %v1532_v39 }
 0x395   : > { %v1894_v42 = vld [vmem:[#allocation4 + $0x8] sm:$0xff] }
 0x396   : > { %1553 = vst.msk [vmem:[#allocation4 + $0x18] sm:$0xff] %vm812_vm3, %v1548_v41  ;;  %1904 = vperm.xlu1 %2723, %v1894_v42  }
 0x397   : > { %v1853_v47 = vpop.permute.xlu1 %1852 }
 0x398   : > { %v1870_v50 = vmul.f32 %v1853_v47, %v1846_v48 }
 0x399   : > { %v1895_v43 = vld [vmem:[#allocation4 + $0x10] sm:$0xff] }
 0x39a   : > { %1867 = vperm.xlu1 %2723, %v2739_v34   ;;  %1909 = vperm.xlu0 %2722, %v1895_v43  }
 0x39b   : > { %v1858_v49 = vpop.permute.xlu1 %1857 }
 0x39c   : > { %v1871_v55 = vmul.f32 %v1858_v49, %v1847_v51 }
 0x39d   : > { %v1896_v44 = vld [vmem:[#allocation4 + $0x18] sm:$0xff] }
 0x39e   : > { %1914 = vperm.xlu0 %2722, %v1896_v44  }
 0x39f   : > { %v1863_v57 = vpop.permute.xlu1 %1862 }
 0x3a0   : > { %v1872_v61 = vmul.f32 %v1863_v57, %v1848_v56 }
 0x3cc   : > { %v1623_v52 = vpop.f32.mrb[12].mxu0 }
 0x3cd   : > { %v1874_v53 = vadd.f32 %v1870_v50, %v1623_v52  ;;  %v2578_v54 = vpop.f32.mrb[13].mxu0 }
 0x3cf   : > { %1878 = vst.msk [vmem:[#allocation5] sm:$0xff] %vm807_vm2, %v1874_v53 }
 0x3d0   : > { %v1696_v58 = vpop.f32.mrb[12].mxu1 }
 0x3d1   : > { %v1875_v59 = vadd.f32 %v1871_v55, %v1696_v58  ;;  %v2583_v60 = vpop.f32.mrb[13].mxu1 }
 0x3d3   : > { %1879 = vst.msk [vmem:[#allocation5 + $0x8] sm:$0xff] %vm807_vm2, %v1875_v59 }
 0x3d4   : > { %v1769_v62 = vpop.f32.mrb[14].mxu0 }
 0x3d5   : > { %v1876_v63 = vadd.f32 %v1872_v61, %v1769_v62  ;;  %v2588_v0 = vpop.f32.mrb[15].mxu0 }
 0x3d6   : > { %v1889_v11 = vld [vmem:[#allocation5] sm:$0xff] }
 0x3d7   : > { %1880 = vst.msk [vmem:[#allocation5 + $0x10] sm:$0xff] %vm807_vm2, %v1876_v63 }
 0x3d8   : > { %v1842_v1 = vpop.f32.mrb[14].mxu1 }
 0x3d9   : > { %v2593_v2 = vpop.f32.mrb[15].mxu1 }
 0x3da   : > { %v1890_v17 = vld [vmem:[#allocation5 + $0x8] sm:$0xff] }
 0x3de   : > { %v1891_v21 = vld [vmem:[#allocation5 + $0x10] sm:$0xff] }
 0x411   : > { %v1900_v3 = vpop.permute.xlu0 %1899 }
 0x412   : > { %2740 = vrcp.f32 %v1900_v3 }
 0x415   : > { %v1905_v4 = vpop.permute.xlu1 %1904 }
 0x416   : > { %2742 = vrcp.f32 %v1905_v4 }
 0x419   : > { %v1910_v6 = vpop.permute.xlu0 %1909  ;;  %v1868_v7 = vpop.permute.xlu1 %1867 }
 0x41a   : > { %2744 = vrcp.f32 %v1910_v6  ;;  %v1873_v8 = vmul.f32 %v1868_v7, %v1849_v5 }
 0x41c   : > { %v2741_v10 = vpop.eup %2740  ;;  %v1877_v12 = vadd.f32 %v1873_v8, %v1842_v1 }
 0x41d   : > { %v1918_v13 = vmul.f32 %v2741_v10, %v1889_v11  ;;  %v1915_v14 = vpop.permute.xlu0 %1914 }
 0x41e   : > { %1881 = vst.msk [vmem:[#allocation5 + $0x18] sm:$0xff] %vm807_vm2, %v1877_v12  ;;  %2746 = vrcp.f32 %v1915_v14 }
 0x41f   : > { %2597 = vmatmul.mubr.msk.f32.vlgmr.msra.gmra.mrb[16].mxu0 %vm807_vm2, %v1918_v13 }
 0x420   : > { %v2743_v16 = vpop.eup %2742  ;;  %2605 = vmatpush3.msra.mxu0 %v1927_v15  ;;  %2606 = vmatprep.mubr.msk.f32.mxu0 %vm2829_vm0, %v2830_v9 }
 0x421   : > { %v1920_v18 = vmul.f32 %v2743_v16, %v1890_v17 }
 0x423   : > { %2602 = vmatmul.mubr.msk.f32.vlgmr.msra.gmra.mrb[16].mxu1 %vm807_vm2, %v1920_v18 }
 0x424   : > { %v2745_v20 = vpop.eup %2744  ;;  %2610 = vmatpush3.msra.mxu1 %v1928_v19  ;;  %2611 = vmatprep.mubr.msk.f32.mxu1 %vm2829_vm0, %v2830_v9 }
 0x425   : > { %v1922_v22 = vmul.f32 %v2745_v20, %v1891_v21  ;;  %v1892_v24 = vld [vmem:[#allocation5 + $0x18] sm:$0xff] }
 0x427   : > { %2607 = vmatmul.mubr.msk.f32.vlgmr.msra.gmra.mrb[18].mxu0 %vm807_vm2, %v1922_v22 }
 0x428   : > { %v2747_v23 = vpop.eup %2746 }
 0x429   : > { %v1924_v25 = vmul.f32 %v2747_v23, %v1892_v24 }
 0x42b   : > { %2612 = vmatmul.mubr.msk.f32.vlgmr.msra.gmra.mrb[18].mxu1 %vm807_vm2, %v1924_v25 }
 0x4f2   : > { %v1998_v26 = vpop.f32.mrb[16].mxu0 }
 0x4f3   : > { %v2598_v27 = vpop.f32.mrb[17].mxu0  ;;  %v2221_v29 = vsel %vm519_vm1, %v1998_v26, 0.0 }
 0x4f6   : > { %v2071_v28 = vpop.f32.mrb[16].mxu1 }
 0x4f7   : > { %v2222_v30 = vsel %vm519_vm1, %v2071_v28, 0.0  ;;  %v2603_v31 = vpop.f32.mrb[17].mxu1 }
 0x4f8   : > { %v2223_v32 = vadd.f32 %v2222_v30, %v2221_v29 }
 0x4fa   : > { %v2144_v9 = vpop.f32.mrb[18].mxu0 }
 0x4fb   : > { %v2224_v33 = vsel %vm519_vm1, %v2144_v9, 0.0  ;;  %v2608_v34 = vpop.f32.mrb[19].mxu0 }
 0x4fc   : > { %v2225_v35 = vadd.f32 %v2224_v33, %v2223_v32 }
 0x4fe   : > { %v2217_v36 = vpop.f32.mrb[18].mxu1 }
 0x4ff   : > { %v2226_v37 = vsel %vm519_vm1, %v2217_v36, 0.0  ;;  %v2613_v39 = vpop.f32.mrb[19].mxu1 }
 0x500   : > { %v2227_v40 = vadd.f32 %v2226_v37, %v2225_v35 }
 0x502   : > { %v2235_v41 = vadd.f32 %v2397_v38, %v2227_v40 }
 0x504   : > { %2236 = vst.msk [vmem:[%s448_s14] sm:$0xff] %vm519_vm1, %v2235_v41 }
 0x505   : > { %2761 = shalt.err (!%p2758_p5)
}
 0x506   : > { %s2762_s28 = scalar_lea.hbm %s3269_s23, 128  ;;  %s2766_s21 = scalar_lea.hbm %s3328_s11, 256 }
 0x507   : > { %p2763_p6 = scmp.ne.s32.totalorder %s3269_s23, %s2762_s28  ;;  %p2767_p10 = scmp.lt.u32.totalorder %s3269_s23, %s3328_s11 }
 0x508   : > { %p2768_p11 = scmp.lt.u32.totalorder %s2766_s21, %s2762_s28  ;;  %p2770_p13 = scmp.lt.u32.totalorder %s2762_s28, %s3269_s23 }
 0x509   : > { %p2764_p7 = pnand %p2763_p6, %p2934_p4 }
 0x50a   : > { %p2769_p12 = por %p2768_p11, %p2767_p10 }
 0x50b   : > { %p2765_p9 = pneg %p2764_p7 }
 0x50c   : > { %p2771_p0 = por %p2770_p13, %p2769_p12 }
 0x50e   : > { %p2772_p1 = pnand %p2771_p0, %p2765_p9 }
 0x510   : > { %2775 = shalt.err (!%p2772_p1)
}
 0x511   : > { %2662 = dma.vmem_to_hbm [thread:$0]  (%p2934_p4), %s3271_s16, 128, %s3269_s23, %s2238_s24  }
 0x512 PF: > { %p2668_p2 = scmp.ge.s32.totalorder %s2826_s22, 2  ;;  %s2264_s15 = sand.u32 1, %s2806_s17  }
 0x513   : > { %s2265_s12 = scalar_lea.sflag [#allocation7], %s2264_s15 }
 0x514   : > { %p2665_p3 = pnand %p2668_p2, %p2941_p8 }
 0x516   : > { %2801 = dma.done.wait (!%p2665_p3), %s2265_s12, 128  }
 0x517   : > { %2803 = vsyncadd (!%p2665_p3), %s2265_s12, 4294967168  ;;  %s24_s22 = sadd.s32 1, %s2826_s22   ;;  %s3335_s20 = sld [smem:[#allocation9_spill]] }
 0x518   : > { %p21_p5 = scmp.ge.s32.totalorder %s24_s22, 4   ;;  %s3336_s21 = sld [smem:[#allocation10_spill]] }
 0x519   : > { %s3337_s17 = smov %s2810_s18  ;;  %s3338_s18 = smov %s2814_s19 }
 0x51a   : > { %s3339_s19 = smov %s2947_s30  ;;  %23 = sbr.rel (!%p21_p5) target bundleno = 4 (0x4), region = 113 }
 0x521   :  { %2270 = vsyncpa [#allocation7], 1 }
 0x522   :  { %2272 = vsyncpa [#allocation7 + $0x1], 1 }

</bundles_post_ra>
